<compile_context>
chip_gen: v6e
topology: v6e:2x2x1
jax: 0.10.0
libtpu: 0.0.40
codegen_flags: <defaults>
</compile_context>

<pallas_src>
import functools

import numpy as np

import jax
import jax.numpy as jnp
from jax import lax
from jax.experimental import pallas as pl
from jax.experimental.pallas import tpu as pltpu


_VMEM = pl.BlockSpec(memory_space=pltpu.MemorySpace.VMEM)


# ----------------------------------------------------------------------------
# Fused kernel: conv_h2h + conv_l2h + 2x nearest upsample + add + BatchNorm.
#
# Operands (whole-array VMEM blocks, lane-dense):
#   xh_ref    (N*H, W*Ch)    high-res rows, row r = (n, y),  col = x*Ch + c
#   xl_ref    (N*H, Wl*Cl)   low-res rows pre-duplicated 2x along H (wrapper glue)
#   b_ref     (3*(W*Ch+Wl*Cl), W*Co)  K-concatenated band weights, both branches
#   gamma_ref (1, W*Co)      BN gamma tiled per output column
#   beta_ref  (1, W*Co)      BN beta  tiled per output column
#   out_ref   (N*H, W*Co)    output rows, col = x*Co + o (full 128-lane stores)
#   tap_ref   (N*H, 3*(W*Ch+Wl*Cl))  VMEM scratch holding the 6 rolled taps
# ----------------------------------------------------------------------------
def _make_fused_kernel(h, co, eps, inv_count):
    eps = float(eps)
    inv_count = float(inv_count)

    def kernel(xh_ref, xl_ref, b_ref, gamma_ref, beta_ref, out_ref, tap_ref):
        f32 = jnp.float32
        xh = xh_ref[...]                    # (R, W*Ch)
        xl = xl_ref[...]                    # (R, Wl*Cl), rows already duplicated
        rows, kh = xh.shape
        kl = xl.shape[1]

        # In-image row index of every output row; drives the zero-pad masks.
        yh = lax.broadcasted_iota(jnp.int32, (rows, kh), 0) % h
        yl = lax.broadcasted_iota(jnp.int32, (rows, kl), 0) % h
        zh = jnp.zeros_like(xh)
        zl = jnp.zeros_like(xl)

        # ky taps = circular sublane roll (XLU) + boundary mask (VPU); no MXU
        # permutation matmuls, no per-tap casts.  High branch: row offsets +-1.
        tap_ref[:, 0 * kh:1 * kh] = jnp.where(yh >= 1, pltpu.roll(xh, 1, axis=0), zh)
        tap_ref[:, 1 * kh:2 * kh] = xh
        tap_ref[:, 2 * kh:3 * kh] = jnp.where(yh <= h - 2,
                                              pltpu.roll(xh, rows - 1, axis=0), zh)
        # Low branch on row-duplicated input: low-res offsets +-1 become +-2 here.
        off = 3 * kh
        tap_ref[:, off + 0 * kl:off + 1 * kl] = jnp.where(
            yl >= 2, pltpu.roll(xl, 2, axis=0), zl)
        tap_ref[:, off + 1 * kl:off + 2 * kl] = xl
        tap_ref[:, off + 2 * kl:off + 3 * kl] = jnp.where(
            yl <= h - 3, pltpu.roll(xl, rows - 2, axis=0), zl)

        # ONE MXU matmul: both 3x3 convs (kx taps + W zero-pad folded into b_ref),
        # the 2x nearest W-upsample of the low branch, and the h2h + l2h add.
        s = jnp.dot(tap_ref[...], b_ref[...], preferred_element_type=f32)  # (R, W*Co)

        # BatchNorm2d, training-mode batch statistics per channel over (N, H, W).
        # Column sums, then same-channel pooling via log2(W) lane-roll+add steps
        # (shifts Co, 2Co, ... wrap at the logical width W*Co).
        colsum = jnp.sum(s, axis=0, keepdims=True)                 # (1, W*Co)
        colsq = jnp.sum(s * s, axis=0, keepdims=True)              # (1, W*Co)
        stats = jnp.concatenate([colsum, colsq], axis=0) * inv_count   # (2, W*Co)
        lane_shift = co
        while lane_shift < s.shape[1]:                             # unrolled: log2(W)
            stats = stats + pltpu.roll(stats, lane_shift, axis=1)
            lane_shift *= 2
        mean = stats[0:1, :]
        ex2 = stats[1:2, :]
        var = ex2 - mean * mean            # single-pass; fine at these counts
        scale = gamma_ref[...] * lax.rsqrt(var + eps)              # gamma/sqrt(var+eps)
        shift_b = beta_ref[...] - mean * scale                     # beta - mean*scale
        out_ref[...] = (s * scale + shift_b).astype(out_ref.dtype)

    return kernel


# ----------------------------------------------------------------------------
# Constant-operator builder (weight-only; built once in the wrapper).
# ----------------------------------------------------------------------------
def _band_weights(w_hwio, w_out, upsample):
    """Pack a 3x3 conv weight (kH,kW,Cin,Co) into 3 banded matrices of shape
    (ky, W_in*Cin, W_out*Co) implementing the kx taps + zero padding along W
    (and, if `upsample`, the nearest 2x upsample along W)."""
    _, _, cin, co = w_hwio.shape
    w_in = w_out // 2 if upsample else w_out
    # place[kx, xi, x] = 1 iff input column xi feeds output column x through tap kx
    place = np.zeros((3, w_in, w_out), np.float32)
    x = np.arange(w_out)
    x_src = x // 2 if upsample else x
    for kx in range(3):
        xi = x_src + kx - 1
        ok = (xi >= 0) & (xi < w_in)
        place[kx, xi[ok], x[ok]] = 1.0
    band = jnp.einsum("kiw,ykco->yicwo", place, w_hwio)   # (3, Win, Cin, Wout, Co)
    return band.reshape(3, w_in * cin, w_out * co)


# ----------------------------------------------------------------------------
# Wrapper
# ----------------------------------------------------------------------------
def last_octave_cb(x_h_nchw, x_l_nchw, params, compute_dtype=jnp.float32,
                   out_dtype=jnp.float32):
    """Forward pass of LastOCtaveCB (stride=1). Inputs NCHW, output NCHW.

    compute_dtype: dtype of activations / conv weights inside the kernel.  Use
    jnp.bfloat16 on v6e/v7x (f32 accumulation via preferred_element_type; BN stats
    stay f32); keep the default float32 on v5e (no bf16 VPU/EUP there).
    out_dtype: set to jnp.bfloat16 if the consumer tolerates it to halve stores."""
    w_h = params["w_h2h"]          # (3, 3, Ch, Co)  HWIO
    w_l = params["w_l2h"]          # (3, 3, Cl, Co)
    n, ch, h, w = x_h_nchw.shape
    _, cl, hl, wl = x_l_nchw.shape
    co = w_h.shape[-1]
    assert h == 2 * hl and w == 2 * wl, "low branch must be half resolution"
    assert w >= 1 and (w & (w - 1)) == 0, "lane-roll channel pooling needs W = 2^k"

    # Activation layout: NCHW -> lane-dense rows (n*y, x*c).  (XLA-side glue; fuse
    # or drop if the surrounding model can supply/consume this layout directly.)
    xh2 = jnp.transpose(x_h_nchw, (0, 2, 3, 1)).reshape(n * h, w * ch)
    xl2 = jnp.transpose(x_l_nchw, (0, 2, 3, 1)).reshape(n * hl, wl * cl)
    # Fold the 2x nearest H-upsample into the input layout: duplicating each low-res
    # row puts both branches on the same (N*H) row axis, so their ky taps and the
    # final add all collapse into the kernel's single band matmul.
    xl2 = jnp.repeat(xl2, 2, axis=0)                              # (N*H, Wl*Cl)
    xh2 = xh2.astype(compute_dtype)
    xl2 = xl2.astype(compute_dtype)

    # Band weights for both branches, K-concatenated (order must match tap_ref).
    bh = _band_weights(w_h, w, upsample=False)                    # (3, W*Ch , W*Co)
    bl = _band_weights(w_l, w, upsample=True)                     # (3, Wl*Cl, W*Co)
    b_all = jnp.concatenate(
        [bh.reshape(3 * w * ch, w * co), bl.reshape(3 * wl * cl, w * co)],
        axis=0).astype(compute_dtype)                             # (144, W*Co)

    gamma_b = jnp.tile(params["gamma"].astype(jnp.float32), w)[None, :]
    beta_b = jnp.tile(params["beta"].astype(jnp.float32), w)[None, :]

    k_total = 3 * (w * ch + wl * cl)
    kernel = _make_fused_kernel(h=h, co=co, eps=1e-5, inv_count=1.0 / (n * h * w))
    out_flat = pl.pallas_call(
        kernel,
        out_shape=jax.ShapeDtypeStruct((n * h, w * co), out_dtype),
        in_specs=[_VMEM] * 5,
        out_specs=_VMEM,
        scratch_shapes=[pltpu.VMEM((n * h, k_total), compute_dtype)],
    )(xh2, xl2, b_all, gamma_b, beta_b)

    # (N*H, W*Co) -> NHWC -> NCHW to match the PyTorch output convention.
    out_nhwc = out_flat.reshape(n, h, w, co)
    return jnp.transpose(out_nhwc, (0, 3, 1, 2))


# ----------------------------------------------------------------------------
# Deterministic parameter init (Conv2d kaiming-uniform-ish, BN gamma=1, beta=0)
# ----------------------------------------------------------------------------
def init_params(key, in_channels=4, out_channels=8, alpha=0.5):
    cl = int(alpha * in_channels)
    ch = in_channels - cl
    k_l, k_h = jax.random.split(key)

    def conv_w(k, cin, cout):
        bound = 1.0 / np.sqrt(cin * 3 * 3)
        return jax.random.uniform(k, (cout, cin, 3, 3), jnp.float32,
                                  minval=-bound, maxval=bound)      # OIHW

    w_l2h_oihw = conv_w(k_l, cl, out_channels)
    w_h2h_oihw = conv_w(k_h, ch, out_channels)
    params = {
        # kernel layout used by the Pallas wrapper: HWIO = (kH, kW, Cin, Cout)
        "w_l2h": jnp.transpose(w_l2h_oihw, (2, 3, 1, 0)),
        "w_h2h": jnp.transpose(w_h2h_oihw, (2, 3, 1, 0)),
        "gamma": jnp.ones((out_channels,), jnp.float32),
        "beta": jnp.zeros((out_channels,), jnp.float32),
    }
    return params, (w_h2h_oihw, w_l2h_oihw)


# ----------------------------------------------------------------------------
# Pure-JAX reference (correctness check only)
# ----------------------------------------------------------------------------
def reference(x_h, x_l, w_h2h_oihw, w_l2h_oihw, gamma, beta):
    conv = lambda x, wgt: lax.conv_general_dilated(
        x, wgt, window_strides=(1, 1), padding=((1, 1), (1, 1)),
        dimension_numbers=("NCHW", "OIHW", "NCHW"),
        precision=lax.Precision.HIGHEST)
    y_l = conv(x_l, w_l2h_oihw)
    y_h = conv(x_h, w_h2h_oihw)
    y_l_up = jnp.repeat(jnp.repeat(y_l, 2, axis=2), 2, axis=3)
    s = y_h + y_l_up
    mean = jnp.mean(s, axis=(0, 2, 3), keepdims=True)
    var = jnp.mean((s - mean) ** 2, axis=(0, 2, 3), keepdims=True)
    g = gamma.reshape(1, -1, 1, 1)
    b = beta.reshape(1, -1, 1, 1)
    return g * (s - mean) * lax.rsqrt(var + 1e-5) + b


if __name__ == "__main__":
    key = jax.random.PRNGKey(0)
    k_params, k_xh, k_xl = jax.random.split(key, 3)

    in_channels, out_channels, alpha = 4, 8, 0.5
    cl = int(alpha * in_channels)      # 2 low-frequency channels
    ch = in_channels - cl              # 2 high-frequency channels

    # X_h: high-frequency branch (full res), X_l: low-frequency branch (half res)
    x_h = jax.random.normal(k_xh, (2, ch, 16, 16), jnp.float32)    # NCHW
    x_l = jax.random.normal(k_xl, (2, cl, 8, 8), jnp.float32)      # NCHW

    params, (w_h2h_oihw, w_l2h_oihw) = init_params(
        k_params, in_channels, out_channels, alpha)

    ref = reference(x_h, x_l, w_h2h_oihw, w_l2h_oihw,
                    params["gamma"], params["beta"])

    # f32 compute path: tight check against the lax.conv reference.
    fwd_f32 = jax.jit(functools.partial(last_octave_cb, compute_dtype=jnp.float32))
    out = jax.block_until_ready(fwd_f32(x_h, x_l, params))
    assert out.shape == (2, out_channels, 16, 16), out.shape
    err = float(jnp.max(jnp.abs(out - ref)))
    assert err < 1e-3, err

    # bf16 operands + f32 accumulation (v6e/v7x fast path): loose check.
    fwd_bf16 = jax.jit(functools.partial(last_octave_cb, compute_dtype=jnp.bfloat16))
    out_bf16 = jax.block_until_ready(fwd_bf16(x_h, x_l, params))
    err_bf16 = float(jnp.max(jnp.abs(out_bf16 - ref)))
    assert err_bf16 < 0.25, err_bf16

    print("KERNEL_OK")
</pallas_src>

<mosaic_0001>
module attributes {stable_mosaic.version = 11 : i64} {
  func.func @kernel(%arg0: memref<32x32xf32, #tpu.memory_space<vmem>>, %arg1: memref<32x16xf32, #tpu.memory_space<vmem>>, %arg2: memref<144x128xf32, #tpu.memory_space<vmem>>, %arg3: memref<1x128xf32, #tpu.memory_space<vmem>>, %arg4: memref<1x128xf32, #tpu.memory_space<vmem>>, %arg5: memref<32x128xf32, #tpu.memory_space<vmem>>, %arg6: memref<32x144xf32, #tpu.memory_space<vmem>>) attributes {dimension_semantics = [], scalar_prefetch = 0 : i64, scratch_operands = 1 : i64, tpu.core_type = #tpu.core_type<tc>} {
    %c0 = arith.constant 0 : index
    %c0_0 = arith.constant 0 : index
    %0 = vector.load %arg0[%c0, %c0_0] : memref<32x32xf32, #tpu.memory_space<vmem>>, vector<32x32xf32>
    %c0_1 = arith.constant 0 : index
    %c0_2 = arith.constant 0 : index
    %1 = vector.load %arg1[%c0_1, %c0_2] : memref<32x16xf32, #tpu.memory_space<vmem>>, vector<32x16xf32>
    %2 = tpu.iota {dimensions = array<i32: 0>} : vector<32x32xi32>
    %c16_i32 = arith.constant 16 : i32
    %c0_i32 = arith.constant 0 : i32
    %3 = arith.cmpi eq, %c16_i32, %c0_i32 : i32
    %c1_i32 = arith.constant 1 : i32
    %4 = arith.select %3, %c1_i32, %c16_i32 : i32
    %5 = vector.broadcast %4 : i32 to vector<32x32xi32>
    %6 = arith.remsi %2, %5 : vector<32x32xi32>
    %c0_i32_3 = arith.constant 0 : i32
    %7 = vector.broadcast %c0_i32_3 : i32 to vector<32x32xi32>
    %8 = arith.cmpi ne, %6, %7 : vector<32x32xi32>
    %c0_i32_4 = arith.constant 0 : i32
    %9 = vector.broadcast %c0_i32_4 : i32 to vector<32x32xi32>
    %10 = arith.cmpi slt, %6, %9 : vector<32x32xi32>
    %c0_i32_5 = arith.constant 0 : i32
    %11 = arith.cmpi slt, %4, %c0_i32_5 : i32
    %12 = vector.broadcast %11 : i1 to vector<32x32xi1>
    %13 = vector.broadcast %12 : vector<32x32xi1> to vector<32x32xi1>
    %14 = arith.xori %10, %13 : vector<32x32xi1>
    %15 = arith.andi %14, %8 : vector<32x32xi1>
    %16 = vector.broadcast %4 : i32 to vector<32x32xi32>
    %17 = arith.addi %6, %16 : vector<32x32xi32>
    %18 = arith.select %15, %17, %6 : vector<32x32xi1>, vector<32x32xi32>
    %19 = tpu.iota {dimensions = array<i32: 0>} : vector<32x16xi32>
    %c16_i32_6 = arith.constant 16 : i32
    %c0_i32_7 = arith.constant 0 : i32
    %20 = arith.cmpi eq, %c16_i32_6, %c0_i32_7 : i32
    %c1_i32_8 = arith.constant 1 : i32
    %21 = arith.select %20, %c1_i32_8, %c16_i32_6 : i32
    %22 = vector.broadcast %21 : i32 to vector<32x16xi32>
    %23 = arith.remsi %19, %22 : vector<32x16xi32>
    %c0_i32_9 = arith.constant 0 : i32
    %24 = vector.broadcast %c0_i32_9 : i32 to vector<32x16xi32>
    %25 = arith.cmpi ne, %23, %24 : vector<32x16xi32>
    %c0_i32_10 = arith.constant 0 : i32
    %26 = vector.broadcast %c0_i32_10 : i32 to vector<32x16xi32>
    %27 = arith.cmpi slt, %23, %26 : vector<32x16xi32>
    %c0_i32_11 = arith.constant 0 : i32
    %28 = arith.cmpi slt, %21, %c0_i32_11 : i32
    %29 = vector.broadcast %28 : i1 to vector<32x16xi1>
    %30 = vector.broadcast %29 : vector<32x16xi1> to vector<32x16xi1>
    %31 = arith.xori %27, %30 : vector<32x16xi1>
    %32 = arith.andi %31, %25 : vector<32x16xi1>
    %33 = vector.broadcast %21 : i32 to vector<32x16xi32>
    %34 = arith.addi %23, %33 : vector<32x16xi32>
    %35 = arith.select %32, %34, %23 : vector<32x16xi1>, vector<32x16xi32>
    %cst = arith.constant 0.000000e+00 : f32
    %36 = vector.broadcast %cst : f32 to vector<32x32xf32>
    %cst_12 = arith.constant 0.000000e+00 : f32
    %37 = vector.broadcast %cst_12 : f32 to vector<32x16xf32>
    %c1_i32_13 = arith.constant 1 : i32
    %38 = vector.broadcast %c1_i32_13 : i32 to vector<32x32xi32>
    %39 = arith.cmpi sge, %18, %38 : vector<32x32xi32>
    %c1_i32_14 = arith.constant 1 : i32
    %40 = tpu.dynamic_rotate %0 by %c1_i32_14 dim 0 : vector<32x32xf32>, i32 -> vector<32x32xf32>
    %41 = arith.select %39, %40, %36 : vector<32x32xi1>, vector<32x32xf32>
    %c0_15 = arith.constant 0 : index
    %c0_16 = arith.constant 0 : index
    %42 = vector.load %arg6[%c0_15, %c0_16] : memref<32x144xf32, #tpu.memory_space<vmem>>, vector<32x32xf32>
    tpu.vector_store %arg6[%c0_15, %c0_16], %41 {strides = array<i32>} : memref<32x144xf32, #tpu.memory_space<vmem>>, vector<32x32xf32>,
    %c0_17 = arith.constant 0 : index
    %c32 = arith.constant 32 : index
    %43 = vector.load %arg6[%c0_17, %c32] : memref<32x144xf32, #tpu.memory_space<vmem>>, vector<32x32xf32>
    tpu.vector_store %arg6[%c0_17, %c32], %0 {strides = array<i32>} : memref<32x144xf32, #tpu.memory_space<vmem>>, vector<32x32xf32>,
    %c14_i32 = arith.constant 14 : i32
    %44 = vector.broadcast %c14_i32 : i32 to vector<32x32xi32>
    %45 = arith.cmpi sle, %18, %44 : vector<32x32xi32>
    %c31_i32 = arith.constant 31 : i32
    %46 = tpu.dynamic_rotate %0 by %c31_i32 dim 0 : vector<32x32xf32>, i32 -> vector<32x32xf32>
    %47 = arith.select %45, %46, %36 : vector<32x32xi1>, vector<32x32xf32>
    %c0_18 = arith.constant 0 : index
    %c64 = arith.constant 64 : index
    %48 = vector.load %arg6[%c0_18, %c64] : memref<32x144xf32, #tpu.memory_space<vmem>>, vector<32x32xf32>
    tpu.vector_store %arg6[%c0_18, %c64], %47 {strides = array<i32>} : memref<32x144xf32, #tpu.memory_space<vmem>>, vector<32x32xf32>,
    %c2_i32 = arith.constant 2 : i32
    %49 = vector.broadcast %c2_i32 : i32 to vector<32x16xi32>
    %50 = arith.cmpi sge, %35, %49 : vector<32x16xi32>
    %c2_i32_19 = arith.constant 2 : i32
    %51 = tpu.dynamic_rotate %1 by %c2_i32_19 dim 0 : vector<32x16xf32>, i32 -> vector<32x16xf32>
    %52 = arith.select %50, %51, %37 : vector<32x16xi1>, vector<32x16xf32>
    %c0_20 = arith.constant 0 : index
    %c96 = arith.constant 96 : index
    %53 = vector.load %arg6[%c0_20, %c96] : memref<32x144xf32, #tpu.memory_space<vmem>>, vector<32x16xf32>
    tpu.vector_store %arg6[%c0_20, %c96], %52 {strides = array<i32>} : memref<32x144xf32, #tpu.memory_space<vmem>>, vector<32x16xf32>,
    %c0_21 = arith.constant 0 : index
    %c112 = arith.constant 112 : index
    %54 = vector.load %arg6[%c0_21, %c112] : memref<32x144xf32, #tpu.memory_space<vmem>>, vector<32x16xf32>
    tpu.vector_store %arg6[%c0_21, %c112], %1 {strides = array<i32>} : memref<32x144xf32, #tpu.memory_space<vmem>>, vector<32x16xf32>,
    %c13_i32 = arith.constant 13 : i32
    %55 = vector.broadcast %c13_i32 : i32 to vector<32x16xi32>
    %56 = arith.cmpi sle, %35, %55 : vector<32x16xi32>
    %c30_i32 = arith.constant 30 : i32
    %57 = tpu.dynamic_rotate %1 by %c30_i32 dim 0 : vector<32x16xf32>, i32 -> vector<32x16xf32>
    %58 = arith.select %56, %57, %37 : vector<32x16xi1>, vector<32x16xf32>
    %c0_22 = arith.constant 0 : index
    %c128 = arith.constant 128 : index
    %59 = vector.load %arg6[%c0_22, %c128] : memref<32x144xf32, #tpu.memory_space<vmem>>, vector<32x16xf32>
    tpu.vector_store %arg6[%c0_22, %c128], %58 {strides = array<i32>} : memref<32x144xf32, #tpu.memory_space<vmem>>, vector<32x16xf32>,
    %c0_23 = arith.constant 0 : index
    %c0_24 = arith.constant 0 : index
    %60 = vector.load %arg6[%c0_23, %c0_24] : memref<32x144xf32, #tpu.memory_space<vmem>>, vector<32x144xf32>
    %c0_25 = arith.constant 0 : index
    %c0_26 = arith.constant 0 : index
    %61 = vector.load %arg2[%c0_25, %c0_26] : memref<144x128xf32, #tpu.memory_space<vmem>>, vector<144x128xf32>
    %cst_27 = arith.constant dense<0.000000e+00> : vector<32x128xf32>
    %62 = tpu.matmul %60, %61, %cst_27 {dimension_numbers = #tpu.dot_dimension_numbers<[1], [0], [0], [1], [0, 0, 1, 1], [], []>} : vector<32x144xf32>, vector<144x128xf32>, vector<32x128xf32> -> vector<32x128xf32>
    %cst_28 = arith.constant dense<0.000000e+00> : vector<128xf32>
    %63 = vector.multi_reduction <add>, %62, %cst_28 [0] : vector<32x128xf32> to vector<128xf32>
    %64 = vector.shape_cast %63 : vector<128xf32> to vector<1x128xf32>
    %65 = arith.mulf %62, %62 : vector<32x128xf32>
    %cst_29 = arith.constant dense<0.000000e+00> : vector<128xf32>
    %66 = vector.multi_reduction <add>, %65, %cst_29 [0] : vector<32x128xf32> to vector<128xf32>
    %67 = vector.shape_cast %66 : vector<128xf32> to vector<1x128xf32>
    %68 = tpu.concatenate %64, %67 in 0 : vector<1x128xf32>, vector<1x128xf32> -> vector<2x128xf32>
    %cst_30 = arith.constant 0.001953125 : f32
    %69 = vector.broadcast %cst_30 : f32 to vector<2x128xf32>
    %70 = arith.mulf %68, %69 : vector<2x128xf32>
    %c8_i32 = arith.constant 8 : i32
    %71 = tpu.dynamic_rotate %70 by %c8_i32 dim 1 : vector<2x128xf32>, i32 -> vector<2x128xf32>
    %72 = arith.addf %70, %71 : vector<2x128xf32>
    %c16_i32_31 = arith.constant 16 : i32
    %73 = tpu.dynamic_rotate %72 by %c16_i32_31 dim 1 : vector<2x128xf32>, i32 -> vector<2x128xf32>
    %74 = arith.addf %72, %73 : vector<2x128xf32>
    %c32_i32 = arith.constant 32 : i32
    %75 = tpu.dynamic_rotate %74 by %c32_i32 dim 1 : vector<2x128xf32>, i32 -> vector<2x128xf32>
    %76 = arith.addf %74, %75 : vector<2x128xf32>
    %c64_i32 = arith.constant 64 : i32
    %77 = tpu.dynamic_rotate %76 by %c64_i32 dim 1 : vector<2x128xf32>, i32 -> vector<2x128xf32>
    %78 = arith.addf %76, %77 : vector<2x128xf32>
    %79 = vector.extract_strided_slice %78 {offsets = [0, 0], sizes = [1, 128], strides = [1, 1]} : vector<2x128xf32> to vector<1x128xf32>
    %80 = vector.extract_strided_slice %78 {offsets = [1, 0], sizes = [1, 128], strides = [1, 1]} : vector<2x128xf32> to vector<1x128xf32>
    %81 = arith.mulf %79, %79 : vector<1x128xf32>
    %82 = arith.subf %80, %81 : vector<1x128xf32>
    %c0_32 = arith.constant 0 : index
    %c0_33 = arith.constant 0 : index
    %83 = vector.load %arg3[%c0_32, %c0_33] : memref<1x128xf32, #tpu.memory_space<vmem>>, vector<1x128xf32>
    %cst_34 = arith.constant 9.99999974E-6 : f32
    %84 = vector.broadcast %cst_34 : f32 to vector<1x128xf32>
    %85 = arith.addf %82, %84 : vector<1x128xf32>
    %86 = math.rsqrt %85 : vector<1x128xf32>
    %87 = arith.mulf %83, %86 : vector<1x128xf32>
    %c0_35 = arith.constant 0 : index
    %c0_36 = arith.constant 0 : index
    %88 = vector.load %arg4[%c0_35, %c0_36] : memref<1x128xf32, #tpu.memory_space<vmem>>, vector<1x128xf32>
    %89 = arith.mulf %79, %87 : vector<1x128xf32>
    %90 = arith.subf %88, %89 : vector<1x128xf32>
    %91 = vector.broadcast %87 : vector<1x128xf32> to vector<32x128xf32>
    %92 = arith.mulf %62, %91 : vector<32x128xf32>
    %93 = vector.broadcast %90 : vector<1x128xf32> to vector<32x128xf32>
    %94 = arith.addf %92, %93 : vector<32x128xf32>
    %c0_37 = arith.constant 0 : index
    %c0_38 = arith.constant 0 : index
    %95 = vector.load %arg5[%c0_37, %c0_38] : memref<32x128xf32, #tpu.memory_space<vmem>>, vector<32x128xf32>
    tpu.vector_store %arg5[%c0_37, %c0_38], %94 {strides = array<i32>} : memref<32x128xf32, #tpu.memory_space<vmem>>, vector<32x128xf32>,
    return
  }
}

</mosaic_0001>

<bundles_post_ra>
// kernel: tile.13
= control target key start
LH: loop header
LB: loop body
LE: loop exit
PB: predicated region body
PF: predicated region fallthrough
CT: control target
= control target key end

     0   :  { %s28_s0 = inlined_call_operand.vmem [shape: f32[8], index: 0, kind: input, shape index: {}]   ;;  %s29_s1 = inlined_call_operand.vmem [shape: f32[16,8], index: 1, kind: output, shape index: {}]  }
   0x1   :  { %v4_v0 = vld [vmem:[%s28_s0] ss:$0 sm:$0xff] }
   0x2   :  { %5 = vst [vmem:[%s29_s1] sm:$0xff] %v4_v0  ;;  %8 = vst [vmem:[%s29_s1 + $0x8] sm:$0xff] %v4_v0 }

// kernel: tile.14
= control target key start
LH: loop header
LB: loop body
LE: loop exit
PB: predicated region body
PF: predicated region fallthrough
CT: control target
= control target key end

     0   :  { %s133_s10 = smov 120   ;;  %s134_s11 = smov 104   ;;  %vm3_vm0 = vcmask 64512   ;;  %vm9_vm1 = vcmask 1048512   ;;  %vm15_vm2 = vcmask 982912   ;;  %vm21_vm3 = vcmask 917312   ;;  %s209_s0 = inlined_call_operand.vmem [shape: f32[16,8], index: 0, kind: input, shape index: {}]   ;;  %s210_s1 = inlined_call_operand.vmem [shape: f32[1,128], index: 1, kind: output, shape index: {}]  }
   0x1   :  { %v103_v0 = vld [vmem:[%s209_s0 + $0xf] sm:$0x1]   ;;  %v105_v1 = vld [vmem:[%s209_s0 + $0xd] sm:$0x1]   ;;  %v104_v2 = vld [vmem:[%s209_s0 + $0xe] sm:$0x1]  }
   0x2   :  { %7 = vrot.lane.b32.xlu0 %v103_v0, %s133_s10  ;;  %19 = vrot.lane.b32.xlu1 %v105_v1, %s134_s11  ;;  %v106_v3 = vld [vmem:[%s209_s0 + $0xc] sm:$0x1]   ;;  %s135_s16 = smov 112   ;;  %s136_s17 = smov 96   ;;  %v107_v4 = vld [vmem:[%s209_s0 + $0xb] sm:$0x1]  }
   0x3   :  { %v108_v5 = vld [vmem:[%s209_s0 + $0xa] sm:$0x1]   ;;  %v2_v6 = vld [vmem:[%s209_s0] sm:$0x1]   ;;  %s137_s24 = smov 88   ;;  %s138_s25 = smov 80  }
   0x4   :  { %4 = vst.msk [vmem:[#allocation0] sm:$0x1] %vm3_vm0, %v2_v6   ;;  %v109_v7 = vld [vmem:[%s209_s0 + $0x9] sm:$0x1]   ;;  %v110_v8 = vld [vmem:[%s209_s0 + $0x8] sm:$0x1]  }
   0x5   :  { %s139_s30 = smov 72   ;;  %s140_s2 = smov 64   ;;  %v111_v9 = vld [vmem:[%s209_s0 + $0x7] sm:$0x1]   ;;  %v112_v10 = vld [vmem:[%s209_s0 + $0x6] sm:$0x1]  }
   0x6   :  { %13 = vrot.lane.b32.xlu0 %v104_v2, %s135_s16  ;;  %25 = vrot.lane.b32.xlu1 %v106_v3, %s136_s17  ;;  %s141_s7 = smov 56   ;;  %s142_s8 = smov 48   ;;  %v113_v11 = vld [vmem:[%s209_s0 + $0x5] sm:$0x1]   ;;  %v114_v12 = vld [vmem:[%s209_s0 + $0x4] sm:$0x1]  }
   0x7   :  { %s143_s13 = smov 40   ;;  %s144_s14 = smov 32   ;;  %v115_v13 = vld [vmem:[%s209_s0 + $0x3] sm:$0x1]   ;;  %v116_v14 = vld [vmem:[%s209_s0 + $0x2] sm:$0x1]  }
   0x8   :  { %s145_s19 = smov 24   ;;  %s146_s20 = smov 16   ;;  %v117_v15 = vld [vmem:[%s209_s0 + $0x1] sm:$0x1]   ;;  %vm27_vm4 = vcmask 851712   ;;  %vm33_vm5 = vcmask 786112  }
   0x9   :  { %s147_s0 = smov 8   ;;  %vm39_vm6 = vcmask 720512   ;;  %vm45_vm7 = vcmask 654912   ;;  %vm51_vm8 = vcmask 589312   ;;  %vm57_vm9 = vcmask 523712  }
   0xa   :  { %31 = vrot.lane.b32.xlu0 %v107_v4, %s137_s24  ;;  %37 = vrot.lane.b32.xlu1 %v108_v5, %s138_s25  ;;  %vm63_vm10 = vcmask 458112   ;;  %vm69_vm11 = vcmask 392512   ;;  %vm75_vm12 = vcmask 326912   ;;  %vm81_vm13 = vcmask 261312  }
   0xb   :  { %vm87_vm14 = vcmask 195712   ;;  %vm93_vm15 = vcmask 130112  }
   0xe   :  { %43 = vrot.lane.b32.xlu0 %v109_v7, %s139_s30  ;;  %49 = vrot.lane.b32.xlu1 %v110_v8, %s140_s2 }
  0x12   :  { %55 = vrot.lane.b32.xlu0 %v111_v9, %s141_s7  ;;  %61 = vrot.lane.b32.xlu1 %v112_v10, %s142_s8 }
  0x16   :  { %67 = vrot.lane.b32.xlu0 %v113_v11, %s143_s13  ;;  %73 = vrot.lane.b32.xlu1 %v114_v12, %s144_s14 }
  0x1a   :  { %79 = vrot.lane.b32.xlu0 %v115_v13, %s145_s19  ;;  %85 = vrot.lane.b32.xlu1 %v116_v14, %s146_s20 }
  0x1e   :  { %91 = vrot.lane.b32.xlu0 %v117_v15, %s147_s0 }
  0x74   :  { %v8_v16 = vpop.permute.xlu0 %7   ;;  %v20_v17 = vpop.permute.xlu1 %19  }
  0x75   :  { %10 = vst.msk [vmem:[#allocation0] sm:$0x1] %vm9_vm1, %v8_v16  }
  0x78   :  { %v14_v18 = vpop.permute.xlu0 %13   ;;  %v26_v19 = vpop.permute.xlu1 %25  }
  0x79   :  { %16 = vst.msk [vmem:[#allocation0] sm:$0x1] %vm15_vm2, %v14_v18  }
  0x7a   :  { %22 = vst.msk [vmem:[#allocation0] sm:$0x1] %vm21_vm3, %v20_v17  }
  0x7b   :  { %28 = vst.msk [vmem:[#allocation0] sm:$0x1] %vm27_vm4, %v26_v19  }
  0x7c   :  { %v32_v20 = vpop.permute.xlu0 %31   ;;  %v38_v21 = vpop.permute.xlu1 %37  }
  0x7d   :  { %34 = vst.msk [vmem:[#allocation0] sm:$0x1] %vm33_vm5, %v32_v20  }
  0x7e   :  { %40 = vst.msk [vmem:[#allocation0] sm:$0x1] %vm39_vm6, %v38_v21  }
  0x80   :  { %v44_v22 = vpop.permute.xlu0 %43   ;;  %v50_v23 = vpop.permute.xlu1 %49  }
  0x81   :  { %46 = vst.msk [vmem:[#allocation0] sm:$0x1] %vm45_vm7, %v44_v22  }
  0x82   :  { %52 = vst.msk [vmem:[#allocation0] sm:$0x1] %vm51_vm8, %v50_v23  }
  0x84   :  { %v56_v24 = vpop.permute.xlu0 %55   ;;  %v62_v25 = vpop.permute.xlu1 %61  }
  0x85   :  { %58 = vst.msk [vmem:[#allocation0] sm:$0x1] %vm57_vm9, %v56_v24  }
  0x86   :  { %64 = vst.msk [vmem:[#allocation0] sm:$0x1] %vm63_vm10, %v62_v25  }
  0x88   :  { %v68_v26 = vpop.permute.xlu0 %67   ;;  %v74_v27 = vpop.permute.xlu1 %73  }
  0x89   :  { %70 = vst.msk [vmem:[#allocation0] sm:$0x1] %vm69_vm11, %v68_v26  }
  0x8a   :  { %76 = vst.msk [vmem:[#allocation0] sm:$0x1] %vm75_vm12, %v74_v27  }
  0x8c   :  { %v80_v28 = vpop.permute.xlu0 %79   ;;  %v86_v29 = vpop.permute.xlu1 %85  }
  0x8d   :  { %82 = vst.msk [vmem:[#allocation0] sm:$0x1] %vm81_vm13, %v80_v28  }
  0x8e   :  { %88 = vst.msk [vmem:[#allocation0] sm:$0x1] %vm87_vm14, %v86_v29  }
  0x90   :  { %v92_v30 = vpop.permute.xlu0 %91  }
  0x91   :  { %94 = vst.msk [vmem:[#allocation0] sm:$0x1] %vm93_vm15, %v92_v30  }
  0x98   :  { %v99_v31 = vld [vmem:[#allocation0] sm:$0x1] }
  0x99   :  { %102 = vst [vmem:[%s210_s1] sm:$0x1] %v99_v31 }

// kernel: last_octave_cb.1
= control target key start
LH: loop header
LB: loop body
LE: loop exit
PB: predicated region body
PF: predicated region fallthrough
CT: control target
= control target key end

     0   :  { %v28_v0 = vlaneseq  ;;  %v510_v4 = vmov 0.0   ;;  %vm238_vm0 = vcmask 130048   ;;  %s511_s26 = smov 112   ;;  %s513_s15 = smov 64   ;;  %vm98_vm11 = vcmask 261120   ;;  %s888_s1 = inlined_call_operand.vmem [shape: f32[32,16], index: 1, kind: input, shape index: {}]   ;;  %s889_s0 = inlined_call_operand.vmem [shape: f32[32,32], index: 0, kind: input, shape index: {}]   ;;  %s890_s2 = inlined_call_operand.vmem [shape: f32[144,128], index: 2, kind: input, shape index: {}]   ;;  %s891_s3 = inlined_call_operand.vmem [shape: f32[1,128], index: 3, kind: input, shape index: {}]   ;;  %s892_s4 = inlined_call_operand.vmem [shape: f32[1,128], index: 4, kind: input, shape index: {}]   ;;  %s893_s5 = inlined_call_operand.vmem [shape: f32[32,128], index: 5, kind: output, shape index: {}]  }
   0x1   :  { %v551_v1 = vld [vmem:[%s888_s1] sm:$0xff]  ;;  %v556_v2 = vld [vmem:[%s888_s1 + $0x8] sm:$0xff]  ;;  %v561_v3 = vld [vmem:[%s888_s1 + $0x10] sm:$0xff]  ;;  %281 = vmatprep.subr.mxu0 %v510_v4  ;;  %464 = vmatprep.subr.mxu1 %v510_v4  ;;  %s514_s18 = smov 96   ;;  %vm119_vm14 = vcmask 523520   ;;  %vm157_vm15 = vcmask 785920  }
   0x2   :  { %v568_v5 = vld [vmem:[%s888_s1 + $0x18] sm:$0xff]  ;;  %v570_v6 = vshrl.u32 %v28_v0, 7  ;;  %v226_v7 = vrot.slane %v556_v2, 2  ;;  %v227_v8 = vrot.slane %v561_v3, 2  ;;  %204 = vrot.lane.b32.xlu1 %v551_v1, %s511_s26  ;;  %v579_v9 = vld [vmem:[%s889_s0] sm:$0xff]  ;;  %v225_v11 = vrot.slane %v551_v1, 2 }
   0x3   :  { %v228_v10 = vrot.slane %v568_v5, 2  ;;  %s512_s1 = smov 32   ;;  %v128_v12 = vrot.slane %v579_v9, 1  ;;  %v589_v13 = vld [vmem:[%s889_s0 + $0x10] sm:$0xff]  ;;  %v594_v14 = vld [vmem:[%s889_s0 + $0x8] sm:$0xff]  ;;  %v166_v15 = vrot.slane %v551_v1, 6 }
   0x4   :  { %107 = vrot.lane.b32.xlu0 %v579_v9, %s512_s1  ;;  %vm229_vm1 = vcmp.lt.s32.totalorder %v570_v6, 6  ;;  %v130_v16 = vrot.slane %v589_v13, 1  ;;  %v129_v17 = vrot.slane %v594_v14, 1  ;;  %v603_v18 = vld [vmem:[%s889_s0 + $0x18] sm:$0xff]  ;;  %vm132_vm2 = vcmp.lt.s32.totalorder %v570_v6, 7  ;;  %v265_v22 = vld [vmem:[%s890_s2 + $0x70] sm:$0xff] }
   0x5   :  { %v266_v19 = vld [vmem:[%s890_s2 + $0x78] sm:$0xff]  ;;  %v230_v20 = vsel %vm229_vm1, %v227_v8, %v228_v10  ;;  %v232_v21 = vsel %vm229_vm1, %v225_v11, %v226_v7  ;;  %v37_v24 = vand.u32 15, %v570_v6  ;;  %v169_v25 = vrot.slane %v568_v5, 6  ;;  %v264_v26 = vld [vmem:[%s890_s2 + $0x68] sm:$0xff]  ;;  %v263_v35 = vld [vmem:[%s890_s2 + $0x60] sm:$0xff]  ;;  %s516_s22 = smov 16  }
   0x6   :  { %282 = vmatpush1.msra.mxu0 %v266_v19  ;;  %482 = vmatpush1.msra.mxu1 %v266_v19  ;;  %241 = vst.msk [vmem:[#allocation2 + $0x28] sm:$0xff] %vm238_vm0, %v230_v20  ;;  %239 = vst.msk [vmem:[#allocation2 + $0x8] sm:$0xff] %vm238_vm0, %v232_v21  ;;  %v135_v23 = vsel %vm132_vm2, %v128_v12, %v129_v17  ;;  %vm170_vm3 = vcmp.lt.s32.totalorder %v570_v6, 2  ;;  %v85_v27 = vrot.slane %v579_v9, 7  ;;  %v131_v28 = vrot.slane %v603_v18, 1  ;;  %v262_v44 = vld [vmem:[%s890_s2 + $0x58] sm:$0xff] }
   0x7   :  { %111 = vrot.lane.b32.xlu1 %v589_v13, %s512_s1  ;;  %283 = vmatprep.subr.mxu0 %v510_v4  ;;  %v30_v29 = vadd.s32 8, %v570_v6  ;;  %v134_v30 = vsel %vm132_vm2, %v129_v17, %v130_v16  ;;  %vm637_vm4 = vcmp.ge.s32.totalorder %v37_v24, 2  ;;  %v174_v32 = vsel %vm170_vm3, %v169_v25, %v166_v15  ;;  %v261_v52 = vld [vmem:[%s890_s2 + $0x50] sm:$0xff]  ;;  %v260_v55 = vld [vmem:[%s890_s2 + $0x48] sm:$0xff]  ;;  %v259_v62 = vld [vmem:[%s890_s2 + $0x40] sm:$0xff] }
   0x8   :  { %145 = vrot.lane.b32.xlu0 %v135_v23, %s513_s15  ;;  %284 = vmatpush1.msra.mxu0 %v265_v22  ;;  %v31_v33 = vadd.s32 16, %v570_v6  ;;  %v167_v34 = vrot.slane %v556_v2, 6  ;;  %v175_v36 = vsel %vm637_vm4, %v174_v32, 0.0  ;;  %v231_v38 = vsel %vm229_vm1, %v226_v7, %v227_v8  ;;  %v256_v9 = vld [vmem:[%s890_s2 + $0x28] sm:$0xff]  ;;  %v253_v17 = vld [vmem:[%s890_s2 + $0x10] sm:$0xff]  ;;  %v267_v19 = vld [vmem:[%s890_s2 + $0x80] sm:$0xff] }
   0x9   :  { %285 = vmatprep.subr.mxu0 %v510_v4  ;;  %465 = vmatprep.subr.mxu1 %v510_v4  ;;  %v44_v37 = vand.u32 15, %v30_v29  ;;  %v168_v39 = vrot.slane %v561_v3, 6  ;;  %v233_v40 = vsel %vm229_vm1, %v228_v10, %v225_v11  ;;  %v87_v41 = vrot.slane %v589_v13, 7  ;;  %v258_v10 = vld [vmem:[%s890_s2 + $0x38] sm:$0xff] }
   0xa   :  { %286 = vmatpush1.msra.mxu0 %v264_v26  ;;  %483 = vmatpush1.msra.mxu1 %v265_v22  ;;  %v51_v42 = vand.u32 15, %v31_v33  ;;  %v32_v43 = vadd.s32 24, %v570_v6  ;;  %v133_v45 = vsel %vm132_vm2, %v130_v16, %v131_v28  ;;  %vm694_vm8 = vcmp.ge.s32.totalorder %v37_v24, 1 }
   0xb   :  { %183 = vrot.lane.b32.xlu1 %v175_v36, %s514_s18  ;;  %287 = vmatprep.subr.mxu0 %v510_v4  ;;  %vm674_vm5 = vcmp.le.s32.totalorder %v44_v37, 14  ;;  %vm222_vm6 = vcmp.le.s32.totalorder %v44_v37, 13  ;;  %v172_v47 = vsel %vm170_vm3, %v167_v34, %v168_v39  ;;  %v88_v54 = vrot.slane %v603_v18, 7 }
   0xc   :  { %109 = vrot.lane.b32.xlu0 %v594_v14, %s512_s1  ;;  %288 = vmatpush1.msra.mxu0 %v263_v35  ;;  %v138_v48 = vsel %vm674_vm5, %v134_v30, 0.0  ;;  %v235_v49 = vsel %vm222_vm6, %v231_v38, 0.0  ;;  %vm684_vm7 = vcmp.ge.s32.totalorder %v51_v42, 2  ;;  %v58_v51 = vand.u32 15, %v32_v43 }
   0xd   :  { %289 = vmatprep.subr.mxu0 %v510_v4  ;;  %466 = vmatprep.subr.mxu1 %v510_v4  ;;  %240 = vst.msk [vmem:[#allocation2 + $0x18] sm:$0xff] %vm238_vm0, %v235_v49  ;;  %vm89_vm9 = vcmp.lt.s32.totalorder %v570_v6, 1  ;;  %vm705_vm12 = vcmp.ge.s32.totalorder %v51_v42, 1  ;;  %v86_v57 = vrot.slane %v594_v14, 7  ;;  %v177_v58 = vsel %vm684_vm7, %v172_v47, 0.0  ;;  %v257_v14 = vld [vmem:[%s890_s2 + $0x30] sm:$0xff] }
   0xe   :  { %290 = vmatpush1.msra.mxu0 %v262_v44  ;;  %484 = vmatpush1.msra.mxu1 %v264_v26  ;;  %vm224_vm10 = vcmp.le.s32.totalorder %v58_v51, 13  ;;  %v93_v60 = vsel %vm89_vm9, %v88_v54, %v85_v27  ;;  %v173_v61 = vsel %vm170_vm3, %v166_v15, %v167_v34  ;;  %v90_v8 = vsel %vm89_vm9, %v87_v41, %v88_v54  ;;  %v255_v15 = vld [vmem:[%s890_s2 + $0x20] sm:$0xff]  ;;  %v244_v20 = vld [vmem:[#allocation2 + $0x8] sm:$0xff] }
   0xf   :  { %149 = vrot.lane.b32.xlu1 %v133_v45, %s513_s15  ;;  %291 = vmatprep.subr.mxu0 %v510_v4  ;;  %v237_v59 = vsel %vm224_vm10, %v233_v40, 0.0  ;;  %v94_v63 = vsel %vm694_vm8, %v93_v60, 0.0  ;;  %v91_v0 = vsel %vm89_vm9, %v86_v57, %v87_v41  ;;  %v92_v7 = vsel %vm89_vm9, %v85_v27, %v86_v57  ;;  %102 = vst.msk [vmem:[#allocation2 + $0x30] sm:$0xff] %vm98_vm11, %v90_v8  ;;  %v248_v21 = vld [vmem:[#allocation2 + $0x28] sm:$0xff] }
  0x10   :  { %147 = vrot.lane.b32.xlu0 %v138_v48, %s513_s15  ;;  %292 = vmatpush1.msra.mxu0 %v261_v52  ;;  %242 = vst.msk [vmem:[#allocation2 + $0x38] sm:$0xff] %vm238_vm0, %v237_v59  ;;  %v96_v1 = vsel %vm705_vm12, %v91_v0, 0.0  ;;  %vm749_vm13 = vcmp.le.s32.totalorder %v58_v51, 14  ;;  %v136_v13 = vsel %vm132_vm2, %v131_v28, %v128_v12  ;;  %v171_v16 = vsel %vm170_vm3, %v168_v39, %v169_v25 }
  0x11   :  { %293 = vmatprep.subr.mxu0 %v510_v4  ;;  %467 = vmatprep.subr.mxu1 %v510_v4  ;;  %99 = vst.msk [vmem:[#allocation2] sm:$0xff] %vm98_vm11, %v94_v63  ;;  %101 = vst.msk [vmem:[#allocation2 + $0x20] sm:$0xff] %vm98_vm11, %v96_v1  ;;  %v140_v12 = vsel %vm749_vm13, %v136_v13, 0.0  ;;  %vm195_vm1 = vcmask 917248   ;;  %vm216_vm2 = vcmask 1048448  }
  0x12   :  { %294 = vmatpush1.msra.mxu0 %v260_v55  ;;  %485 = vmatpush1.msra.mxu1 %v263_v35  ;;  %100 = vst.msk [vmem:[#allocation2 + $0x10] sm:$0xff] %vm98_vm11, %v92_v7 }
  0x13   :  { %187 = vrot.lane.b32.xlu1 %v177_v58, %s514_s18  ;;  %295 = vmatprep.subr.mxu0 %v510_v4 }
  0x14   :  { %185 = vrot.lane.b32.xlu0 %v173_v61, %s514_s18  ;;  %296 = vmatpush1.msra.mxu0 %v259_v62  ;;  %v246_v30 = vld [vmem:[#allocation2 + $0x18] sm:$0xff] }
  0x15   :  { %297 = vmatprep.subr.mxu0 %v510_v4  ;;  %468 = vmatprep.subr.mxu1 %v510_v4 }
  0x16   :  { %298 = vmatpush1.msra.mxu0 %v258_v10  ;;  %486 = vmatpush1.msra.mxu1 %v262_v44 }
  0x17   :  { %208 = vrot.lane.b32.xlu1 %v561_v3, %s511_s26  ;;  %299 = vmatprep.subr.mxu0 %v510_v4  ;;  %v252_v3 = vld [vmem:[%s890_s2 + $0x8] sm:$0xff]  ;;  %v250_v37 = vld [vmem:[#allocation2 + $0x38] sm:$0xff] }
  0x18   :  { %206 = vrot.lane.b32.xlu0 %v556_v2, %s511_s26  ;;  %300 = vmatpush1.msra.mxu0 %v257_v14  ;;  %v254_v2 = vld [vmem:[%s890_s2 + $0x18] sm:$0xff] }
  0x19   :  { %301 = vmatprep.subr.mxu0 %v510_v4  ;;  %469 = vmatprep.subr.mxu1 %v510_v4 }
  0x1a   :  { %302 = vmatpush1.msra.mxu0 %v256_v9  ;;  %487 = vmatpush1.msra.mxu1 %v261_v52 }
  0x1b   :  { %151 = vrot.lane.b32.xlu1 %v140_v12, %s513_s15  ;;  %303 = vmatprep.subr.mxu0 %v510_v4 }
  0x1c   :  { %113 = vrot.lane.b32.xlu0 %v603_v18, %s512_s1  ;;  %470 = vmatprep.subr.mxu1 %v510_v4  ;;  %v268_v18 = vld [vmem:[%s890_s2 + $0x88] sm:$0xff] }
  0x1d   :  { %304 = vmatpush1.msra.mxu0 %v255_v15  ;;  %488 = vmatpush1.msra.mxu1 %v260_v55 }
  0x1e   :  { %305 = vmatprep.subr.mxu0 %v510_v4  ;;  %471 = vmatprep.subr.mxu1 %v510_v4 }
  0x1f   :  { %210 = vrot.lane.b32.xlu1 %v568_v5, %s511_s26  ;;  %306 = vmatpush1.msra.mxu0 %v254_v2  ;;  %v251_v5 = vld [vmem:[%s890_s2] sm:$0xff]  ;;  %s515_s2 = smov 8  }
  0x20   :  { %189 = vrot.lane.b32.xlu0 %v171_v16, %s514_s18  ;;  %489 = vmatpush1.msra.mxu1 %v259_v62 }
  0x21   :  { %307 = vmatprep.subr.mxu0 %v510_v4  ;;  %472 = vmatprep.subr.mxu1 %v510_v4 }
  0x22   :  { %308 = vmatpush1.msra.mxu0 %v253_v17  ;;  %490 = vmatpush1.msra.mxu1 %v258_v10 }
  0x23   :  { %309 = vmatprep.subr.mxu0 %v510_v4  ;;  %473 = vmatprep.subr.mxu1 %v510_v4 }
  0x24   :  { %310 = vmatpush1.msra.mxu0 %v252_v3  ;;  %491 = vmatpush1.msra.mxu1 %v257_v14 }
  0x25   :  { %311 = vmatprep.subr.mxu0 %v510_v4  ;;  %474 = vmatprep.subr.mxu1 %v510_v4 }
  0x26   :  { %312 = vmatpush1.msra.mxu0 %v251_v5  ;;  %492 = vmatpush1.msra.mxu1 %v256_v9 }
  0x27   :  { %341 = vmatprep.subr.mxu0 %v510_v4  ;;  %475 = vmatprep.subr.mxu1 %v510_v4 }
  0x28   :  { %342 = vmatpush2.msra.mxu0 %v268_v18  ;;  %493 = vmatpush1.msra.mxu1 %v255_v15 }
  0x29   :  { %343 = vmatprep.subr.mxu0 %v510_v4  ;;  %476 = vmatprep.subr.mxu1 %v510_v4 }
  0x2a   :  { %344 = vmatpush2.msra.mxu0 %v267_v19  ;;  %460 = vmatprep.mubr.msk.f32.mxu0 %vm238_vm0, %v244_v20 }
  0x2b   :  { %494 = vmatpush1.msra.mxu1 %v254_v2  ;;  %462 = vmatprep.mubr.msk.f32.mxu1 %vm238_vm0, %v248_v21 }
  0x2c   :  { %477 = vmatprep.subr.mxu1 %v510_v4 }
  0x2d   :  { %495 = vmatpush1.msra.mxu1 %v253_v17 }
  0x2e   :  { %478 = vmatprep.subr.mxu1 %v510_v4 }
  0x2f   :  { %496 = vmatpush1.msra.mxu1 %v252_v3 }
  0x30   :  { %479 = vmatprep.subr.mxu1 %v510_v4 }
  0x31   :  { %497 = vmatpush1.msra.mxu1 %v251_v5 }
  0x32   :  { %480 = vmatprep.subr.mxu1 %v510_v4 }
  0x33   :  { %498 = vmatpush2.msra.mxu1 %v268_v18 }
  0x34   :  { %481 = vmatprep.subr.mxu1 %v510_v4 }
  0x35   :  { %499 = vmatpush2.msra.mxu1 %v267_v19 }
  0x74   :  { %v205_v22 = vpop.permute.xlu1 %204 }
  0x76   :  { %v108_v23 = vpop.permute.xlu0 %107 }
  0x77   :  { %120 = vst.msk [vmem:[#allocation2] sm:$0xff] %vm119_vm14, %v108_v23 }
  0x79   :  { %v112_v24 = vpop.permute.xlu1 %111 }
  0x7a   :  { %122 = vst.msk [vmem:[#allocation2 + $0x20] sm:$0xff] %vm119_vm14, %v112_v24  ;;  %v146_v25 = vpop.permute.xlu0 %145 }
  0x7b   :  { %158 = vst.msk [vmem:[#allocation2] sm:$0xff] %vm157_vm15, %v146_v25  ;;  %v517_v25 = vmov 1966171168  }
  0x7d   :  { %v184_v26 = vpop.permute.xlu1 %183 }
  0x7e   :  { %196 = vst.msk [vmem:[#allocation2] sm:$0xff] %vm195_vm1, %v184_v26  ;;  %v110_v27 = vpop.permute.xlu0 %109  ;;  %v413_v26 = vunpack.c.l.s4 %v517_v25 }
  0x7f   :  { %217 = vst.msk [vmem:[#allocation2] sm:$0xff] %vm216_vm2, %v205_v22 }
  0x80   :  { %121 = vst.msk [vmem:[#allocation2 + $0x10] sm:$0xff] %vm119_vm14, %v110_v27  ;;  %v414_v27 = vunpack.c.0.s8 %v413_v26 }
  0x81   :  { %v150_v4 = vpop.permute.xlu1 %149 }
  0x82   :  { %160 = vst.msk [vmem:[#allocation2 + $0x20] sm:$0xff] %vm157_vm15, %v150_v4  ;;  %v148_v28 = vpop.permute.xlu0 %147  ;;  %v417_v4 = vsub.s32 %v414_v27, %v570_v6 }
  0x83   :  { %159 = vst.msk [vmem:[#allocation2 + $0x10] sm:$0xff] %vm157_vm15, %v148_v28 }
  0x85   :  { %v188_v29 = vpop.permute.xlu1 %187 }
  0x86   :  { %198 = vst.msk [vmem:[#allocation2 + $0x20] sm:$0xff] %vm195_vm1, %v188_v29  ;;  %v186_v31 = vpop.permute.xlu0 %185  ;;  %v243_v32 = vld [vmem:[#allocation2] sm:$0xff] }
  0x87   :  { %197 = vst.msk [vmem:[#allocation2 + $0x10] sm:$0xff] %vm195_vm1, %v186_v31  ;;  %346 = vmatmul.mubr.f32.vlgmr.msra.gmra.mxu0 %v243_v32  ;;  %v408_v31 = vld [vmem:[%s891_s3] sm:$0x1]  ;;  %v435_v32 = vsub.s32 0, %v570_v6 }
  0x88   :  { %461 = vmatprep.mubr.msk.f32.mxu0 %vm238_vm0, %v246_v30 }
  0x89   :  { %v209_v33 = vpop.permute.xlu1 %208 }
  0x8a   :  { %219 = vst.msk [vmem:[#allocation2 + $0x20] sm:$0xff] %vm216_vm2, %v209_v33  ;;  %v207_v34 = vpop.permute.xlu0 %206 }
  0x8b   :  { %218 = vst.msk [vmem:[#allocation2 + $0x10] sm:$0xff] %vm216_vm2, %v207_v34 }
  0x8d   :  { %v152_v35 = vpop.permute.xlu1 %151 }
  0x8e   :  { %v114_v36 = vpop.permute.xlu0 %113 }
  0x8f   :  { %123 = vst.msk [vmem:[#allocation2 + $0x30] sm:$0xff] %vm119_vm14, %v114_v36 }
  0x90   :  { %161 = vst.msk [vmem:[#allocation2 + $0x30] sm:$0xff] %vm157_vm15, %v152_v35  ;;  %v429_v35 = vld [vmem:[%s892_s4] sm:$0x1] }
  0x91   :  { %v247_v38 = vld [vmem:[#allocation2 + $0x20] sm:$0xff]  ;;  %v211_v39 = vpop.permute.xlu1 %210 }
  0x92   :  { %v190_v40 = vpop.permute.xlu0 %189  ;;  %356 = vmatmul.mubr.f32.vlgmr.msra.gmra.mxu1 %v247_v38  ;;  %v245_v41 = vld [vmem:[#allocation2 + $0x10] sm:$0xff] }
  0x93   :  { %199 = vst.msk [vmem:[#allocation2 + $0x30] sm:$0xff] %vm195_vm1, %v190_v40  ;;  %351 = vmatmul.mubr.f32.gmra.mxu0 %v245_v41  ;;  %463 = vmatprep.mubr.msk.f32.mxu1 %vm238_vm0, %v250_v37  ;;  %vm388_vm0 = vcmask 1040384  }
  0x94   :  { %220 = vst.msk [vmem:[#allocation2 + $0x30] sm:$0xff] %vm216_vm2, %v211_v39 }
  0x9b   :  { %v249_v42 = vld [vmem:[#allocation2 + $0x30] sm:$0xff] }
  0x9c   :  { %361 = vmatmul.mubr.f32.gmra.mxu1 %v249_v42 }
 0x147   :  { %v848_v43 = vpop.f32.mrf.mxu0 }
 0x148   :  { %v375_v50 = vmul.f32 %v848_v43, %v848_v43 }
 0x149   :  { %v349_v44 = vpop.f32.mrf.mxu0 }
 0x152   :  { %v850_v45 = vpop.f32.mrf.mxu1 }
 0x153   :  { %v852_v46 = vpop.f32.mrf.mxu0  ;;  %v377_v53 = vmul.f32 %v850_v45, %v850_v45 }
 0x154   :  { %v359_v47 = vpop.f32.mrf.mxu1  ;;  %v376_v48 = vmul.f32 %v852_v46, %v852_v46  ;;  %v366_v51 = vadd.f32 %v852_v46, %v848_v43 }
 0x155   :  { %v354_v49 = vpop.f32.mrf.mxu0 }
 0x156   :  { %v379_v52 = vadd.f32 %v376_v48, %v375_v50  ;;  %v367_v54 = vadd.f32 %v366_v51, %v850_v45 }
 0x158   :  { %v380_v56 = vadd.f32 %v379_v52, %v377_v53 }
 0x15c   :  { %v362_v55 = vpop.f32.mrf.mxu1 }
 0x15d   :  { %v368_v57 = vadd.f32 %v367_v54, %v362_v55  ;;  %v378_v58 = vmul.f32 %v362_v55, %v362_v55 }
 0x15e   :  { %v364_v59 = vpop.f32.mrf.mxu1 }
 0x15f   :  { %v369_v60 = vrot.slane %v368_v57, 4  ;;  %v381_v61 = vadd.f32 %v380_v56, %v378_v58 }
 0x161   :  { %v370_v62 = vadd.f32 %v369_v60, %v368_v57  ;;  %v382_v63 = vrot.slane %v381_v61, 4 }
 0x163   :  { %v371_v0 = vrot.slane %v370_v62, 2  ;;  %v383_v1 = vadd.f32 %v382_v63, %v381_v61 }
 0x165   :  { %v372_v7 = vadd.f32 %v371_v0, %v370_v62  ;;  %v384_v8 = vrot.slane %v383_v1, 2 }
 0x167   :  { %v373_v10 = vrot.slane %v372_v7, 1  ;;  %v385_v11 = vadd.f32 %v384_v8, %v383_v1 }
 0x169   :  { %v386_v13 = vrot.slane %v385_v11, 1  ;;  %v374_v14 = vadd.f32 %v373_v10, %v372_v7 }
 0x16b   :  { %v387_v9 = vadd.f32 %v386_v13, %v385_v11 }
 0x16d   :  { %v389_v12 = vsel %vm388_vm0, %v374_v14, %v387_v9 }
 0x16e   :  { %v390_v15 = vmul.f32 0.001953125, %v389_v12 }
 0x170   :  { %391 = vrot.lane.b32.xlu0 %v390_v15, %s515_s2 }
 0x1e2   :  { %v392_v2 = vpop.permute.xlu0 %391 }
 0x1e3   :  { %v393_v16 = vadd.f32 %v392_v2, %v390_v15 }
 0x1e5   :  { %394 = vrot.lane.b32.xlu1 %v393_v16, %s516_s22 }
 0x257   :  { %v395_v17 = vpop.permute.xlu1 %394 }
 0x258   :  { %v396_v3 = vadd.f32 %v395_v17, %v393_v16 }
 0x25a   :  { %397 = vrot.lane.b32.xlu0 %v396_v3, %s512_s1 }
 0x2cc   :  { %v398_v5 = vpop.permute.xlu0 %397 }
 0x2cd   :  { %v399_v18 = vadd.f32 %v398_v5, %v396_v3 }
 0x2cf   :  { %400 = vrot.lane.b32.xlu1 %v399_v18, %s513_s15 }
 0x341   :  { %v401_v19 = vpop.permute.xlu1 %400 }
 0x342   :  { %v402_v20 = vadd.f32 %v401_v19, %v399_v18 }
 0x344   :  { %v403_v21 = vmul.f32 %v402_v20, %v402_v20 }
 0x346   :  { %v405_v22 = vrot.slane %v403_v21, 7 }
 0x348   :  { %v407_v23 = vsub.f32 %v402_v20, %v405_v22 }
 0x34a   :  { %v409_v24 = vadd.f32 1e-05, %v407_v23 }
 0x34c   :  { %508 = vrsqrt.f32 %v409_v24 }
 0x359   :  { %v509_v28 = vpop.eup %508 }
 0x35a   :  { %v418_v29 = vrot.slane %v509_v28, %v417_v4 }
 0x35c   :  { %v419_v30 = vcombine.high %v418_v29, %v418_v29 }
 0x35e   :  { %v426_v33 = vrot.slane %v419_v30, %v417_v4 }
 0x360   :  { %v428_v34 = vmul.f32 %v426_v33, %v408_v31 }
 0x362   :  { %v430_v36 = vmul.f32 %v428_v34, %v402_v20  ;;  %v436_v37 = vrot.slane %v428_v34, %v435_v32 }
 0x364   :  { %v431_v38 = vsub.f32 %v429_v35, %v430_v36  ;;  %v438_v39 = vmul.f32 %v436_v37, %v848_v43  ;;  %v439_v40 = vmul.f32 %v436_v37, %v852_v46  ;;  %v440_v41 = vmul.f32 %v436_v37, %v850_v45 }
 0x365   :  { %v441_v42 = vmul.f32 %v436_v37, %v362_v55 }
 0x366   :  { %v446_v44 = vrot.slane %v431_v38, %v435_v32 }
 0x368   :  { %v448_v47 = vadd.f32 %v446_v44, %v438_v39  ;;  %v449_v48 = vadd.f32 %v446_v44, %v439_v40  ;;  %v450_v6 = vadd.f32 %v446_v44, %v440_v41  ;;  %v451_v49 = vadd.f32 %v446_v44, %v441_v42 }
 0x36a   :  { %452 = vst [vmem:[%s893_s5] sm:$0xff] %v448_v47  ;;  %453 = vst [vmem:[%s893_s5 + $0x8] sm:$0xff] %v449_v48 }
 0x36b   :  { %454 = vst [vmem:[%s893_s5 + $0x10] sm:$0xff] %v450_v6  ;;  %455 = vst [vmem:[%s893_s5 + $0x18] sm:$0xff] %v451_v49 }

</bundles_post_ra>
